<compile_context>
chip_gen: v7x
topology: tpu7x:2x2x1
jax: 0.10.0
libtpu: 0.0.40
codegen_flags: <defaults>
</compile_context>

<pallas_src>
import functools
import math

import jax
import jax.numpy as jnp
import numpy as np
from jax import lax
from jax.experimental import pallas as pl
from jax.experimental.pallas import tpu as pltpu


def create_positional_encoding(max_len: int, d_model: int) -> np.ndarray:
    """Exact replica of Embeddings.create_positinal_encoding (incl. its formula)."""
    assert d_model % 2 == 0, "torch code writes pe[pos, i+1]; d_model must be even"
    pe = np.zeros((max_len, d_model), dtype=np.float32)
    pos = np.arange(max_len, dtype=np.float64)[:, None]
    even = np.arange(0, d_model, 2, dtype=np.float64)
    # NOTE: intentionally replicates the module's exponent (2*i/d_model), which
    # differs from the standard Transformer sinusoid.
    pe[:, 0::2] = np.sin(pos / 10000.0 ** (2.0 * even / d_model))
    pe[:, 1::2] = np.cos(pos / 10000.0 ** (2.0 * (even + 1.0) / d_model))
    return pe  # (max_len, d_model); torch adds a leading batch dim of 1


# ---------------------------------------------------------------------------
# Kernels: one grid step = TS tokens of one batch row.
#   ids_ref : (1, TS, 1) int32  VMEM block (token ids, already clipped)
#   emb_ref : (vocab, D)        VMEM-resident embedding table
#   pe_ref  : (TS, D)           sliced positional-encoding block (streamed)
#   out_ref : (1, TS, D)        output tile
# ---------------------------------------------------------------------------

def _embed_kernel_onehot(ids_ref, emb_ref, pe_ref, out_ref, *, vocab, scale):
    """Small-vocab path: row selection as a one-hot matmul on the idle MXU."""
    ids = ids_ref[0]                                             # (TS, 1) int32
    iota = lax.broadcasted_iota(jnp.int32, (ids.shape[0], vocab), 1)
    one_hot = (ids == iota).astype(emb_ref.dtype)                # (TS, vocab)
    rows = jnp.dot(one_hot, emb_ref[...],
                   preferred_element_type=jnp.float32)           # (TS, D) exact
    out_ref[0] = (rows * scale + pe_ref[...]).astype(out_ref.dtype)
    # TODO(synk): nn.Dropout(0.1) is stochastic, training-mode only; eval-mode
    # forward is identity, so it is omitted here.


def _embed_kernel_take(ids_ref, emb_ref, pe_ref, out_ref, *, vocab, scale):
    """Larger-vocab (still VMEM-resident) path: single vectorized gather."""
    del vocab
    idx = ids_ref[0][:, 0]                                       # (TS,) int32
    rows = jnp.take(emb_ref[...], idx, axis=0).astype(jnp.float32)
    # TODO(synk): if Mosaic rejects this gather lowering for some shape, the
    # alternative is an HBM-resident table with double-buffered per-row DMA
    # gathers (worthwhile for rows >= ~2 KiB).
    out_ref[0] = (rows * scale + pe_ref[...]).astype(out_ref.dtype)


# ---------------------------------------------------------------------------
# Wrapper
# ---------------------------------------------------------------------------

def _cdiv(a, b):
    return (a + b - 1) // b


def _round_up(a, b):
    return _cdiv(a, b) * b


def _vmem_capacity_bytes() -> int:
    """Generation-aware VMEM capacity (v5e/v6e: 128 MiB, v7x: 64 MiB/TC)."""
    try:
        return int(pltpu.get_tpu_info().vmem_capacity_bytes)
    except Exception:
        return 64 * 1024 * 1024  # conservative default (v7x per-TC)


def embeddings_forward(ids: jax.Array, embed_table: jax.Array, pe: jax.Array,
                       *, block_tokens: int | None = None,
                       onehot_max_vocab: int = 2048) -> jax.Array:
    """Forward pass of Embeddings (eval mode).

    ids:         (B, S) int32 token indices
    embed_table: (vocab, d_model) float32 (bf16 also accepted; upcast in-kernel)
    pe:          (max_len, d_model) float32
    returns:     (B, S, d_model) float32
    """
    B, S = ids.shape
    vocab, D = embed_table.shape
    max_len = pe.shape[0]
    assert S <= max_len, "sequence length exceeds positional-encoding max_len"
    scale = float(math.sqrt(D))

    # ---- per-generation VMEM budget -------------------------------------
    vmem_cap = _vmem_capacity_bytes()
    budget = int(0.75 * vmem_cap)

    # ---- tokens per grid step --------------------------------------------
    # Target ~2 MiB output tile (amortizes ~0.35 us/step fixed overhead and
    # keeps writeback at the HBM roofline), capped at 8192 tokens and at the
    # (8-aligned) sequence length.
    if block_tokens is None:
        block_tokens = max(8, min(8192, (2 * 1024 * 1024) // (4 * D)))
    ts = max(8, min(_round_up(S, 8), (block_tokens // 8) * 8))

    table_bytes = vocab * D * embed_table.dtype.itemsize

    def _step_bytes(t):
        pe_b = 2 * t * D * 4          # double-buffered PE block
        out_b = 2 * t * D * 4         # double-buffered output block
        ids_b = 2 * t * 128 * 4       # (t, 1) i32 block pads lanes to 128
        return pe_b + out_b + ids_b

    # Shrink the tile until the VMEM-resident plan fits.  The table is counted
    # double-buffered (conservative: covers the fallback if Buffered(1) is not
    # honored), plus ~2 MiB headroom for compiler-internal scratch.
    while ts > 8 and 2 * table_bytes + _step_bytes(ts) + (2 << 20) > budget:
        ts = max(8, ((ts // 2) // 8) * 8)
    if 2 * table_bytes + _step_bytes(ts) + (2 << 20) > budget:
        # TODO(synk): large-vocab path -- HBM-resident table (memory_space=
        # pl.ANY) with a double-buffered batch of per-row async-copy gathers.
        raise NotImplementedError(
            "embedding table too large for the VMEM-resident lookup kernel")

    s_pad = _cdiv(S, ts) * ts
    n_sb = s_pad // ts

    # ---- prepare inputs ---------------------------------------------------
    # NOTE: out-of-range ids are clipped (PyTorch nn.Embedding would raise);
    # this is a deliberate OOB guard, documented behavioral difference.
    flat = jnp.clip(ids.astype(jnp.int32), 0, vocab - 1)
    if s_pad > S:
        flat = jnp.pad(flat, ((0, 0), (0, s_pad - S)))
    ids3 = flat.reshape(B, s_pad, 1)

    pe_used = pe[:S].astype(jnp.float32)
    if s_pad > S:
        pe_used = jnp.pad(pe_used, ((0, s_pad - S), (0, 0)))

    use_onehot = vocab <= onehot_max_vocab
    kernel = functools.partial(
        _embed_kernel_onehot if use_onehot else _embed_kernel_take,
        vocab=vocab, scale=scale)

    vmem_limit = int(min(int(0.9 * vmem_cap),
                         max(2 * table_bytes + _step_bytes(ts) + (4 << 20),
                             32 << 20)))

    def _build(table_pipeline_mode):
        if table_pipeline_mode is not None:
            emb_spec = pl.BlockSpec((vocab, D), lambda b, s: (0, 0),
                                    pipeline_mode=table_pipeline_mode)
        else:
            emb_spec = pl.BlockSpec((vocab, D), lambda b, s: (0, 0))
        return pl.pallas_call(
            kernel,
            out_shape=jax.ShapeDtypeStruct((B, s_pad, D), jnp.float32),
            grid_spec=pltpu.PrefetchScalarGridSpec(
                num_scalar_prefetch=0,
                grid=(B, n_sb),
                in_specs=[
                    # token ids: (1, TS, 1) VMEM block per step
                    pl.BlockSpec((1, ts, 1), lambda b, s: (b, s, 0)),
                    # embedding table: constant index -> VMEM-resident
                    emb_spec,
                    # positional encodings: sliced (TS, D) block per step
                    pl.BlockSpec((ts, D), lambda b, s: (s, 0)),
                ],
                out_specs=pl.BlockSpec((1, ts, D), lambda b, s: (b, s, 0)),
            ),
            compiler_params=pltpu.CompilerParams(
                dimension_semantics=("parallel", "parallel"),
                vmem_limit_bytes=vmem_limit,
            ),
        )

    try:
        # Single-buffer the constant-index resident table (halves its VMEM
        # footprint; the constant block index never re-DMAs anyway).
        out = _build(pl.Buffered(1))(ids3, embed_table, pe_used)
    except Exception:
        # Fallback for jax/Mosaic builds that reject pipeline_mode here.
        out = _build(None)(ids3, embed_table, pe_used)

    return out[:, :S, :]


if __name__ == "__main__":
    # Small shapes consistent with the module's forward.
    vocab_size = 32
    d_model = 128
    max_len = 50
    B, S = 2, 8

    key = jax.random.PRNGKey(0)
    k_emb, k_ids = jax.random.split(key)

    # Deterministic parameter init (nn.Embedding default is N(0, 1)).
    embed_table = jax.random.normal(k_emb, (vocab_size, d_model), dtype=jnp.float32)
    pe = jnp.asarray(create_positional_encoding(max_len, d_model))

    ids = jax.random.randint(k_ids, (B, S), 0, vocab_size, dtype=jnp.int32)

    out = embeddings_forward(ids, embed_table, pe)
    out = jax.block_until_ready(out)

    # Pure-JAX reference for correctness.
    ref = embed_table[ids] * math.sqrt(d_model) + pe[None, :S, :]
    np.testing.assert_allclose(np.asarray(out), np.asarray(ref),
                               rtol=1e-5, atol=1e-5)

    print("KERNEL_OK")
</pallas_src>

<mosaic_0001>
module attributes {stable_mosaic.version = 11 : i64} {
  func.func @_embed_kernel_onehot(%arg0: i32, %arg1: i32, %arg2: memref<1x8x1xi32, #tpu.memory_space<vmem>>, %arg3: memref<32x128xf32, #tpu.memory_space<vmem>>, %arg4: memref<8x128xf32, #tpu.memory_space<vmem>>, %arg5: memref<1x8x128xf32, #tpu.memory_space<vmem>>) attributes {dimension_semantics = [#tpu.dimension_semantics<parallel>, #tpu.dimension_semantics<parallel>], iteration_bounds = array<i64: 2, 1>, scalar_prefetch = 0 : i64, scratch_operands = 0 : i64, tpu.core_type = #tpu.core_type<tc>, window_params = [{transform_indices = @transform_0, window_bounds = array<i64: 1, 8, 1>}, {pipeline_mode = #tpu.pipeline_mode<synchronous>, transform_indices = @transform_1, window_bounds = array<i64: 32, 128>}, {transform_indices = @transform_2, window_bounds = array<i64: 8, 128>}, {transform_indices = @transform_3, window_bounds = array<i64: 1, 8, 128>}]} {
    %c0 = arith.constant 0 : index
    %c0_0 = arith.constant 0 : index
    %c0_1 = arith.constant 0 : index
    %0 = vector.load %arg2[%c0, %c0_0, %c0_1] : memref<1x8x1xi32, #tpu.memory_space<vmem>>, vector<1x8x1xi32>
    %1 = vector.shape_cast %0 : vector<1x8x1xi32> to vector<8x1xi32>
    %2 = tpu.iota {dimensions = array<i32: 1>} : vector<8x32xi32>
    %3 = vector.broadcast %1 : vector<8x1xi32> to vector<8x32xi32>
    %4 = arith.cmpi eq, %3, %2 : vector<8x32xi32>
    %5 = arith.extui %4 : vector<8x32xi1> to vector<8x32xi32>
    %6 = arith.sitofp %5 : vector<8x32xi32> to vector<8x32xf32>
    %c0_2 = arith.constant 0 : index
    %c0_3 = arith.constant 0 : index
    %7 = vector.load %arg3[%c0_2, %c0_3] : memref<32x128xf32, #tpu.memory_space<vmem>>, vector<32x128xf32>
    %cst = arith.constant dense<0.000000e+00> : vector<8x128xf32>
    %8 = tpu.matmul %6, %7, %cst {dimension_numbers = #tpu.dot_dimension_numbers<[1], [0], [0], [1], [0, 0, 1, 1], [], []>} : vector<8x32xf32>, vector<32x128xf32>, vector<8x128xf32> -> vector<8x128xf32>
    %cst_4 = arith.constant 11.3137083 : f32
    %9 = vector.broadcast %cst_4 : f32 to vector<8x128xf32>
    %10 = arith.mulf %8, %9 : vector<8x128xf32>
    %c0_5 = arith.constant 0 : index
    %c0_6 = arith.constant 0 : index
    %11 = vector.load %arg4[%c0_5, %c0_6] : memref<8x128xf32, #tpu.memory_space<vmem>>, vector<8x128xf32>
    %12 = arith.addf %10, %11 : vector<8x128xf32>
    %c0_7 = arith.constant 0 : index
    %c0_8 = arith.constant 0 : index
    %c0_9 = arith.constant 0 : index
    %13 = vector.load %arg5[%c0_7, %c0_8, %c0_9] : memref<1x8x128xf32, #tpu.memory_space<vmem>>, vector<1x8x128xf32>
    %14 = vector.shape_cast %13 : vector<1x8x128xf32> to vector<8x128xf32>
    %15 = vector.shape_cast %12 : vector<8x128xf32> to vector<1x8x128xf32>
    tpu.vector_store %arg5[%c0_7, %c0_8, %c0_9], %15 {strides = array<i32>} : memref<1x8x128xf32, #tpu.memory_space<vmem>>, vector<1x8x128xf32>,
    return
  }
  func.func @transform_0(%arg0: i32, %arg1: i32) -> (i32, i32, i32) {
    %c0_i32 = arith.constant 0 : i32
    %c0_i32_0 = arith.constant 0 : i32
    return %arg0, %arg1, %c0_i32 : i32, i32, i32
  }
  func.func @transform_1(%arg0: i32, %arg1: i32) -> (i32, i32) {
    %c0_i32 = arith.constant 0 : i32
    %c0_i32_0 = arith.constant 0 : i32
    %c0_i32_1 = arith.constant 0 : i32
    return %c0_i32, %c0_i32_0 : i32, i32
  }
  func.func @transform_2(%arg0: i32, %arg1: i32) -> (i32, i32) {
    %c0_i32 = arith.constant 0 : i32
    %c0_i32_0 = arith.constant 0 : i32
    return %arg1, %c0_i32 : i32, i32
  }
  func.func @transform_3(%arg0: i32, %arg1: i32) -> (i32, i32, i32) {
    %c0_i32 = arith.constant 0 : i32
    %c0_i32_0 = arith.constant 0 : i32
    return %arg0, %arg1, %c0_i32 : i32, i32, i32
  }
}

module attributes {stable_mosaic.version = 11 : i64} {
  func.func @_embed_kernel_onehot(%arg0: i32, %arg1: i32, %arg2: memref<1x8x1xi32, #tpu.memory_space<vmem>>, %arg3: memref<32x128xf32, #tpu.memory_space<vmem>>, %arg4: memref<8x128xf32, #tpu.memory_space<vmem>>, %arg5: memref<1x8x128xf32, #tpu.memory_space<vmem>>) attributes {dimension_semantics = [#tpu.dimension_semantics<parallel>, #tpu.dimension_semantics<parallel>], iteration_bounds = array<i64: 2, 1>, scalar_prefetch = 0 : i64, scratch_operands = 0 : i64, tpu.core_type = #tpu.core_type<tc>, window_params = [{transform_indices = @transform_0, window_bounds = array<i64: 1, 8, 1>}, {pipeline_mode = #tpu.pipeline_mode<synchronous>, transform_indices = @transform_1, window_bounds = array<i64: 32, 128>}, {transform_indices = @transform_2, window_bounds = array<i64: 8, 128>}, {transform_indices = @transform_3, window_bounds = array<i64: 1, 8, 128>}]} {
    %c0 = arith.constant 0 : index
    %c0_0 = arith.constant 0 : index
    %c0_1 = arith.constant 0 : index
    %0 = vector.load %arg2[%c0, %c0_0, %c0_1] : memref<1x8x1xi32, #tpu.memory_space<vmem>>, vector<1x8x1xi32>
    %1 = vector.shape_cast %0 : vector<1x8x1xi32> to vector<8x1xi32>
    %2 = tpu.iota {dimensions = array<i32: 1>} : vector<8x32xi32>
    %3 = vector.broadcast %1 : vector<8x1xi32> to vector<8x32xi32>
    %4 = arith.cmpi eq, %3, %2 : vector<8x32xi32>
    %5 = arith.extui %4 : vector<8x32xi1> to vector<8x32xi32>
    %6 = arith.sitofp %5 : vector<8x32xi32> to vector<8x32xf32>
    %c0_2 = arith.constant 0 : index
    %c0_3 = arith.constant 0 : index
    %7 = vector.load %arg3[%c0_2, %c0_3] : memref<32x128xf32, #tpu.memory_space<vmem>>, vector<32x128xf32>
    %cst = arith.constant dense<0.000000e+00> : vector<8x128xf32>
    %8 = tpu.matmul %6, %7, %cst {dimension_numbers = #tpu.dot_dimension_numbers<[1], [0], [0], [1], [0, 0, 1, 1], [], []>} : vector<8x32xf32>, vector<32x128xf32>, vector<8x128xf32> -> vector<8x128xf32>
    %cst_4 = arith.constant 11.3137083 : f32
    %9 = vector.broadcast %cst_4 : f32 to vector<8x128xf32>
    %10 = arith.mulf %8, %9 : vector<8x128xf32>
    %c0_5 = arith.constant 0 : index
    %c0_6 = arith.constant 0 : index
    %11 = vector.load %arg4[%c0_5, %c0_6] : memref<8x128xf32, #tpu.memory_space<vmem>>, vector<8x128xf32>
    %12 = arith.addf %10, %11 : vector<8x128xf32>
    %c0_7 = arith.constant 0 : index
    %c0_8 = arith.constant 0 : index
    %c0_9 = arith.constant 0 : index
    %13 = vector.load %arg5[%c0_7, %c0_8, %c0_9] : memref<1x8x128xf32, #tpu.memory_space<vmem>>, vector<1x8x128xf32>
    %14 = vector.shape_cast %13 : vector<1x8x128xf32> to vector<8x128xf32>
    %15 = vector.shape_cast %12 : vector<8x128xf32> to vector<1x8x128xf32>
    tpu.vector_store %arg5[%c0_7, %c0_8, %c0_9], %15 {strides = array<i32>} : memref<1x8x128xf32, #tpu.memory_space<vmem>>, vector<1x8x128xf32>,
    return
  }
  func.func @transform_0(%arg0: i32, %arg1: i32) -> (i32, i32, i32) {
    %c0_i32 = arith.constant 0 : i32
    %c0_i32_0 = arith.constant 0 : i32
    return %arg0, %arg1, %c0_i32 : i32, i32, i32
  }
  func.func @transform_1(%arg0: i32, %arg1: i32) -> (i32, i32) {
    %c0_i32 = arith.constant 0 : i32
    %c0_i32_0 = arith.constant 0 : i32
    %c0_i32_1 = arith.constant 0 : i32
    return %c0_i32, %c0_i32_0 : i32, i32
  }
  func.func @transform_2(%arg0: i32, %arg1: i32) -> (i32, i32) {
    %c0_i32 = arith.constant 0 : i32
    %c0_i32_0 = arith.constant 0 : i32
    return %arg1, %c0_i32 : i32, i32
  }
  func.func @transform_3(%arg0: i32, %arg1: i32) -> (i32, i32, i32) {
    %c0_i32 = arith.constant 0 : i32
    %c0_i32_0 = arith.constant 0 : i32
    return %arg0, %arg1, %c0_i32 : i32, i32, i32
  }
}

</mosaic_0001>

<bundles_post_ra>
// kernel: tpu_custom_call.1
= control target key start
LH: loop header
LB: loop body
LE: loop exit
PB: predicated region body
PF: predicated region fallthrough
CT: control target
= control target key end

     0   :  { %8 = vsyncpa [#allocation3], 0  ;;  %s831_s0 = inlined_call_operand.vmem [shape: s32[2,8,1], index: 0, kind: input, shape index: {}]   ;;  %s832_s1 = inlined_call_operand.hbm [shape: f32[32,128], index: 1, kind: input, shape index: {}]   ;;  %s833_s2 = inlined_call_operand.vmem [shape: f32[8,128], index: 2, kind: input, shape index: {}]   ;;  %s834_s3 = inlined_call_operand.hbm [shape: f32[2,8,128], index: 3, kind: output, shape index: {}]  }
   0x1   :  { %9 = vsyncpa [#allocation4], 0 }
   0x2   :  { %11 = vsyncpa [#allocation4 + $0x1], 0  ;;  %s678_s12 = smov 0   ;;  %s680_s13 = smov 0  }
   0x3   :  { %s682_s14 = smov 0   ;;  %s684_s15 = smov 0  }
   0x4   :  { %s686_s16 = smov 0   ;;  %s688_s17 = smov 0  }
   0x5 LB: > { %s427_s18 = sadd.s32 4294967295, %s648_s17   ;;  %s428_s19 = sadd.s32 4294967294, %s648_s17   ;;  %s648_s17 = sphi %s688_s17, %s17_s17   ;;  %s644_s16 = sphi %s686_s16, %s852_s16   ;;  %s640_s15 = sphi %s684_s15, %s851_s15   ;;  %s636_s14 = sphi %s682_s14, %s850_s14   ;;  %s632_s13 = sphi %s680_s13, %s849_s13   ;;  %s628_s12 = sphi %s678_s12, %s848_s12  }
   0x6   : > { %s29_s20 = sadd.s32 1, %s644_s16  ;;  %s113_s21 = sadd.s32 1, %s636_s14 }
   0x7   : > { %p31_p0 = scmp.ge.s32.totalorder %s29_s20, 2  ;;  %p123_p1 = scmp.ne.s32.totalorder %s636_s14, %s632_s13 }
   0x8   : > { %p124_p2 = scmp.eq.s32.totalorder %s427_s18, 1  ;;  %p129_p3 = scmp.ne.s32.totalorder %s632_s13, %s628_s12 }
   0x9   : > { %s854_s20 = smov (%p31_p0, %s29_s20), 0  ;;  %p130_p5 = scmp.eq.s32.totalorder %s428_s19, 1 }
   0xa   : > { %p718_p4 = por %p124_p2, %p123_p1  ;;  %s108_s23 = ssub.s32 %s644_s16, %s854_s20 }
   0xb   : > { %p429_p6 = scmp.ge.s32.totalorder %s648_s17, 1  ;;  %p111_p7 = scmp.eq.s32.totalorder %s108_s23, 0 }
   0xc   : > { %s839_s22 = scalar_select %p718_p4, 1, 0 }
   0xd   : > { %p725_p8 = por %p130_p5, %p129_p3  ;;  %p137_p9 = scmp.lt.s32.totalorder %s648_s17, 3 }
   0xe   : > { %s731_s25 = scalar_select %p111_p7, %s636_s14, %s113_s21  }
   0xf   : > { %s840_s24 = scalar_select %p725_p8, 1, 0 }
  0x10   : > { %p733_p10 = pnand %p429_p6, %p137_p9  ;;  %p737_p11 = scmp.eq.s32.totalorder %s427_s18, 0 }
  0x11   : > { %s650_s28 = smov [#allocation2]   ;;  %s538_s6 = scalar_lea.hbm %s832_s1, 512 }
  0x12   : > { %s841_s26 = scalar_select %p733_p10, 1, 0 }
  0x13   : > { %s842_s27 = scalar_select %p737_p11, 1, 0 }
  0x14   : > { %p471_p12 = pneg %p733_p10  ;;  %s149_s29 = sshll.u32 %s650_s28, 4  ;;  %s150_s29 = int_to_ptr.vmem [resolvable:$true] %s149_s29 }
  0x15   : > { %p539_p0 = scmp.ne.s32.totalorder %s832_s1, %s538_s6  ;;  %p545_p5 = scmp.lt.u32.totalorder %s538_s6, %s832_s1 }
  0x16   : > { %p745_p13 = pnand %p737_p11, %p471_p12 }
  0x18   : > { %p540_p1 = pneg %p745_p13 }
  0x1a   : > { %p541_p2 = pnand %p540_p1, %p539_p0 }
  0x1c   : > { %p542_p3 = pneg %p541_p2 }
  0x1e   : > { %p547_p6 = pnand %p545_p5, %p542_p3 }
  0x20   : > { %550 = shalt.err (!%p547_p6)
}
  0x21   : > { %s551_s11 = scalar_lea.vmem %s150_s29, 512  ;;  %p559_p8 = scmp.lt.s32.totalorder %s150_s29, %s150_s29 }
  0x22   : > { %p552_p7 = scmp.ne.s32.totalorder %s150_s29, %s551_s11  ;;  %p560_p4 = scmp.lt.s32.totalorder %s551_s11, %s551_s11 }
  0x24   : > { %p554_p9 = pnand %p552_p7, %p540_p1  ;;  %p561_p11 = por %p560_p4, %p559_p8 }
  0x26   : > { %p555_p12 = pneg %p554_p9 }
  0x28   : > { %p562_p10 = pnand %p561_p11, %p555_p12 }
  0x2a   : > { %565 = shalt.err (!%p562_p10)
}
  0x2b   : > { %s651_s18 = smov 128   ;;  %s652_s19 = smov 8  }
  0x2c   : > { %474 = dma.hbm_to_vmem [thread:$0]  (!%p745_p13), %s832_s1, 512, %s150_s29, [#allocation3], %s651_s18, %s651_s18, %s652_s19  }
  0x2d   : > { %p844_p0 = scmp.ne.s32.totalorder %s841_s26, 0 }
  0x2e   : > { %p845_p2 = scmp.ne.s32.totalorder (!%p844_p0), %s842_s27, 0 }
  0x2f   : > { %182 = sbr.rel (%p844_p0) target bundleno = 422 (0x1a6), region = 32 }
  0x36   : > { %619 = dma.done.wait (%p845_p2), [#allocation3], 512  }
  0x37   : > { %621 = vsyncadd (%p845_p2), [#allocation3], 4294966784  ;;  %p212_p4 = scmp.lt.s32.totalorder %s640_s15, 1  ;;  %v653_v0 = vmov 0   ;;  %v654_v1 = vmov 0.0|0.0   ;;  %v232_v3 = vld [vmem:[#allocation2] sm:$0xff]  ;;  %v224_v10 = vlaneseq }
  0x38   : > { %537 = vset.pattern.permute.xlu0 %v653_v0  ;;  %459 = vmatprep.subr.bf16.mxu0 %v654_v1  ;;  %v233_v4 = vld [vmem:[#allocation2 + $0x8] sm:$0xff]  ;;  %v234_v6 = vld [vmem:[#allocation2 + $0x10] sm:$0xff]  ;;  %v235_v7 = vld [vmem:[#allocation2 + $0x18] sm:$0xff]  ;;  %vm655_vm0 = vmmov 0   ;;  %v656_v8 = vmov 0.0   ;;  %vm236_vm1 = vcmask 261120  }
  0x39   : > { %s213_s28 = scalar_select %p212_p4, %s640_s15, 1  ;;  %v460_v5 = vpack.c.bf16 %v233_v4, %v232_v3  ;;  %456 = vmatprep.mubr.msk.f32.mxu0 %vm655_vm0, %v656_v8  ;;  %v463_v9 = vpack.c.bf16 %v235_v7, %v234_v6  ;;  %v225_v11 = vand.u32 127, %v224_v10  ;;  %v311_v15 = vld [vmem:[%s833_s2] sm:$0xff] }
  0x3a   : > { %s209_s27 = sand.u32 1, %s632_s13   ;;  %s440_s8 = sshll.u32 %s640_s15, 7 }
  0x3b   : > { %s436_s30 = sshll.u32 %s213_s28, 3  ;;  %461 = vmatpush3.bf16.msra.mxu0 %v460_v5  ;;  %s435_s5 = sshll.u32 %s209_s27, 3 }
  0x3c   : > { %s218_s26 = scalar_lea.vmem %s831_s0, %s436_s30  ;;  %462 = vmatprep.subr.bf16.mxu0 %v654_v1  ;;  %s211_s9 = scalar_lea.vmem [#allocation5], %s435_s5 }
  0x3d   : > { %v223_v2 = vld [vmem:[%s218_s26] sm:$0xff]  ;;  %s329_s10 = sshll.u32 %s211_s9, 4  ;;  %s784_s19 = scalar_lea.hbm %s834_s3, %s440_s8  ;;  %s786_s10 = int_to_ptr.vmem [resolvable:$true] %s329_s10 }
  0x3e   : > { %227 = vperm.xlu0 %537, %v223_v2   ;;  %s315_s21 = scalar_lea.sflag [#allocation4], %s209_s27  ;;  %s566_s23 = scalar_lea.vmem %s786_s10, 128 }
  0x3f   : > { %464 = vmatpush3.bf16.msra.mxu0 %v463_v9  ;;  %p567_p8 = scmp.ne.s32.totalorder %s786_s10, %s566_s23  ;;  %p846_p10 = scmp.ne.s32.totalorder %s839_s22, 0 }
  0x40   : > { %s657_s15 = smov [#allocation5]  }
  0x41   : > { %p568_p11 = pnand %p567_p8, %p846_p10  ;;  %s570_s28 = sshll.u32 %s657_s15, 4  ;;  %s571_s28 = int_to_ptr.vmem [resolvable:$false] %s570_s28 }
  0x42   : > { %s572_s30 = scalar_lea.vmem %s571_s28, 256  ;;  %p573_p1 = scmp.lt.s32.totalorder %s786_s10, %s571_s28 }
  0x43   : > { %p569_p13 = pneg %p568_p11  ;;  %p574_p3 = scmp.lt.s32.totalorder %s572_s30, %s566_s23 }
  0x45   : > { %p575_p5 = por %p574_p3, %p573_p1 }
  0x47   : > { %p576_p6 = pnand %p575_p5, %p569_p13 }
  0xbd   : > { %v228_v12 = vpop.permute.xlu0 %227 }
  0xbe   : > { %vm229_vm2 = vcmp.eq.s32.totalorder %v228_v12, %v225_v11 }
  0xbf   : > { %v437_v13 = vsel %vm229_vm2, 1.0, %v656_v8 }
  0xc0   : > { %457 = vmatmul.mubr.msk.f32.vlgmr.msra.gmra.mrb[0].mxu0 %vm236_vm1, %v437_v13 }
 0x193   : > { %v306_v14 = vpop.f32.mrb[0].mxu0 }
 0x194   : > { %v310_v16 = vmul.f32 11.313708, %v306_v14  ;;  %v458_v17 = vpop.f32.mrb[1].mxu0 }
 0x196   : > { %v312_v18 = vadd.f32 %v311_v15, %v310_v16 }
 0x198   : > { %313 = vst [vmem:[%s211_s9] sm:$0xff] %v312_v18 }
 0x199   : > { %579 = shalt.err (!%p576_p6)
}
 0x19a   : > { %s580_s4 = scalar_lea.hbm %s784_s19, 128  ;;  %s584_s27 = scalar_lea.hbm %s834_s3, 256 }
 0x19b   : > { %p581_p7 = scmp.ne.s32.totalorder %s784_s19, %s580_s4  ;;  %p585_p0 = scmp.lt.u32.totalorder %s784_s19, %s834_s3 }
 0x19c   : > { %p586_p2 = scmp.lt.u32.totalorder %s584_s27, %s580_s4  ;;  %p588_p8 = scmp.lt.u32.totalorder %s580_s4, %s784_s19 }
 0x19d   : > { %p582_p9 = pnand %p581_p7, %p846_p10 }
 0x19e   : > { %p587_p4 = por %p586_p2, %p585_p0 }
 0x19f   : > { %p583_p12 = pneg %p582_p9 }
 0x1a0   : > { %p589_p11 = por %p588_p8, %p587_p4 }
 0x1a2   : > { %p590_p13 = pnand %p589_p11, %p583_p12 }
 0x1a4   : > { %593 = shalt.err (!%p590_p13)
}
 0x1a5   : > { %469 = dma.vmem_to_hbm [thread:$0]  (%p846_p10), %s786_s10, 128, %s784_s19, %s315_s21  }
 0x1a6 PF: > { %p481_p1 = scmp.ge.s32.totalorder %s648_s17, 2  ;;  %s341_s7 = sand.u32 1, %s628_s12  }
 0x1a7   : > { %p847_p3 = scmp.ne.s32.totalorder %s840_s24, 0  ;;  %s342_s8 = scalar_lea.sflag [#allocation4], %s341_s7 }
 0x1a9   : > { %p476_p5 = pnand %p481_p1, %p847_p3 }
 0x1ab   : > { %623 = dma.done.wait (!%p476_p5), %s342_s8, 128  }
 0x1ac   : > { %625 = vsyncadd (!%p476_p5), %s342_s8, 4294967168  ;;  %s17_s17 = sadd.s32 1, %s648_s17   ;;  %s848_s12 = smov %s632_s13 }
 0x1ad   : > { %p14_p6 = scmp.ge.s32.totalorder %s17_s17, 4   ;;  %s849_s13 = smov %s636_s14 }
 0x1ae   : > { %s850_s14 = smov %s731_s25  ;;  %s851_s15 = smov %s644_s16 }
 0x1af   : > { %s852_s16 = smov %s854_s20  ;;  %16 = sbr.rel (!%p14_p6) target bundleno = 5 (0x5), region = 75 }
 0x1b6   :  { %347 = vsyncpa [#allocation3], 1 }
 0x1b7   :  { %349 = vsyncpa [#allocation3 + $0x1], 1 }
 0x1b8   :  { %350 = vsyncpa [#allocation4], 1 }
 0x1b9   :  { %352 = vsyncpa [#allocation4 + $0x1], 1 }

// kernel: tpu_custom_call.1
= control target key start
LH: loop header
LB: loop body
LE: loop exit
PB: predicated region body
PF: predicated region fallthrough
CT: control target
= control target key end

     0   :  { %8 = vsyncpa [#allocation3], 0  ;;  %s831_s0 = inlined_call_operand.vmem [shape: s32[2,8,1], index: 0, kind: input, shape index: {}]   ;;  %s832_s1 = inlined_call_operand.hbm [shape: f32[32,128], index: 1, kind: input, shape index: {}]   ;;  %s833_s2 = inlined_call_operand.vmem [shape: f32[8,128], index: 2, kind: input, shape index: {}]   ;;  %s834_s3 = inlined_call_operand.hbm [shape: f32[2,8,128], index: 3, kind: output, shape index: {}]  }
   0x1   :  { %9 = vsyncpa [#allocation4], 0 }
   0x2   :  { %11 = vsyncpa [#allocation4 + $0x1], 0  ;;  %s678_s12 = smov 0   ;;  %s680_s13 = smov 0  }
   0x3   :  { %s682_s14 = smov 0   ;;  %s684_s15 = smov 0  }
   0x4   :  { %s686_s16 = smov 0   ;;  %s688_s17 = smov 0  }
   0x5 LB: > { %s427_s18 = sadd.s32 4294967295, %s648_s17   ;;  %s428_s19 = sadd.s32 4294967294, %s648_s17   ;;  %s648_s17 = sphi %s688_s17, %s17_s17   ;;  %s644_s16 = sphi %s686_s16, %s852_s16   ;;  %s640_s15 = sphi %s684_s15, %s851_s15   ;;  %s636_s14 = sphi %s682_s14, %s850_s14   ;;  %s632_s13 = sphi %s680_s13, %s849_s13   ;;  %s628_s12 = sphi %s678_s12, %s848_s12  }
   0x6   : > { %s29_s20 = sadd.s32 1, %s644_s16  ;;  %s113_s21 = sadd.s32 1, %s636_s14 }
   0x7   : > { %p31_p0 = scmp.ge.s32.totalorder %s29_s20, 2  ;;  %p123_p1 = scmp.ne.s32.totalorder %s636_s14, %s632_s13 }
   0x8   : > { %p124_p2 = scmp.eq.s32.totalorder %s427_s18, 1  ;;  %p129_p3 = scmp.ne.s32.totalorder %s632_s13, %s628_s12 }
   0x9   : > { %s854_s20 = smov (%p31_p0, %s29_s20), 0  ;;  %p130_p5 = scmp.eq.s32.totalorder %s428_s19, 1 }
   0xa   : > { %p718_p4 = por %p124_p2, %p123_p1  ;;  %s108_s23 = ssub.s32 %s644_s16, %s854_s20 }
   0xb   : > { %p429_p6 = scmp.ge.s32.totalorder %s648_s17, 1  ;;  %p111_p7 = scmp.eq.s32.totalorder %s108_s23, 0 }
   0xc   : > { %s839_s22 = scalar_select %p718_p4, 1, 0 }
   0xd   : > { %p725_p8 = por %p130_p5, %p129_p3  ;;  %p137_p9 = scmp.lt.s32.totalorder %s648_s17, 3 }
   0xe   : > { %s731_s25 = scalar_select %p111_p7, %s636_s14, %s113_s21  }
   0xf   : > { %s840_s24 = scalar_select %p725_p8, 1, 0 }
  0x10   : > { %p733_p10 = pnand %p429_p6, %p137_p9  ;;  %p737_p11 = scmp.eq.s32.totalorder %s427_s18, 0 }
  0x11   : > { %s650_s28 = smov [#allocation2]   ;;  %s538_s6 = scalar_lea.hbm %s832_s1, 512 }
  0x12   : > { %s841_s26 = scalar_select %p733_p10, 1, 0 }
  0x13   : > { %s842_s27 = scalar_select %p737_p11, 1, 0 }
  0x14   : > { %p471_p12 = pneg %p733_p10  ;;  %s149_s29 = sshll.u32 %s650_s28, 4  ;;  %s150_s29 = int_to_ptr.vmem [resolvable:$true] %s149_s29 }
  0x15   : > { %p539_p0 = scmp.ne.s32.totalorder %s832_s1, %s538_s6  ;;  %p545_p5 = scmp.lt.u32.totalorder %s538_s6, %s832_s1 }
  0x16   : > { %p745_p13 = pnand %p737_p11, %p471_p12 }
  0x18   : > { %p540_p1 = pneg %p745_p13 }
  0x1a   : > { %p541_p2 = pnand %p540_p1, %p539_p0 }
  0x1c   : > { %p542_p3 = pneg %p541_p2 }
  0x1e   : > { %p547_p6 = pnand %p545_p5, %p542_p3 }
  0x20   : > { %550 = shalt.err (!%p547_p6)
}
  0x21   : > { %s551_s11 = scalar_lea.vmem %s150_s29, 512  ;;  %p559_p8 = scmp.lt.s32.totalorder %s150_s29, %s150_s29 }
  0x22   : > { %p552_p7 = scmp.ne.s32.totalorder %s150_s29, %s551_s11  ;;  %p560_p4 = scmp.lt.s32.totalorder %s551_s11, %s551_s11 }
  0x24   : > { %p554_p9 = pnand %p552_p7, %p540_p1  ;;  %p561_p11 = por %p560_p4, %p559_p8 }
  0x26   : > { %p555_p12 = pneg %p554_p9 }
  0x28   : > { %p562_p10 = pnand %p561_p11, %p555_p12 }
  0x2a   : > { %565 = shalt.err (!%p562_p10)
}
  0x2b   : > { %s651_s18 = smov 128   ;;  %s652_s19 = smov 8  }
  0x2c   : > { %474 = dma.hbm_to_vmem [thread:$0]  (!%p745_p13), %s832_s1, 512, %s150_s29, [#allocation3], %s651_s18, %s651_s18, %s652_s19  }
  0x2d   : > { %p844_p0 = scmp.ne.s32.totalorder %s841_s26, 0 }
  0x2e   : > { %p845_p2 = scmp.ne.s32.totalorder (!%p844_p0), %s842_s27, 0 }
  0x2f   : > { %182 = sbr.rel (%p844_p0) target bundleno = 422 (0x1a6), region = 32 }
  0x36   : > { %619 = dma.done.wait (%p845_p2), [#allocation3], 512  }
  0x37   : > { %621 = vsyncadd (%p845_p2), [#allocation3], 4294966784  ;;  %p212_p4 = scmp.lt.s32.totalorder %s640_s15, 1  ;;  %v653_v0 = vmov 0   ;;  %v654_v1 = vmov 0.0|0.0   ;;  %v232_v3 = vld [vmem:[#allocation2] sm:$0xff]  ;;  %v224_v10 = vlaneseq }
  0x38   : > { %537 = vset.pattern.permute.xlu0 %v653_v0  ;;  %459 = vmatprep.subr.bf16.mxu0 %v654_v1  ;;  %v233_v4 = vld [vmem:[#allocation2 + $0x8] sm:$0xff]  ;;  %v234_v6 = vld [vmem:[#allocation2 + $0x10] sm:$0xff]  ;;  %v235_v7 = vld [vmem:[#allocation2 + $0x18] sm:$0xff]  ;;  %vm655_vm0 = vmmov 0   ;;  %v656_v8 = vmov 0.0   ;;  %vm236_vm1 = vcmask 261120  }
  0x39   : > { %s213_s28 = scalar_select %p212_p4, %s640_s15, 1  ;;  %v460_v5 = vpack.c.bf16 %v233_v4, %v232_v3  ;;  %456 = vmatprep.mubr.msk.f32.mxu0 %vm655_vm0, %v656_v8  ;;  %v463_v9 = vpack.c.bf16 %v235_v7, %v234_v6  ;;  %v225_v11 = vand.u32 127, %v224_v10  ;;  %v311_v15 = vld [vmem:[%s833_s2] sm:$0xff] }
  0x3a   : > { %s209_s27 = sand.u32 1, %s632_s13   ;;  %s440_s8 = sshll.u32 %s640_s15, 7 }
  0x3b   : > { %s436_s30 = sshll.u32 %s213_s28, 3  ;;  %461 = vmatpush3.bf16.msra.mxu0 %v460_v5  ;;  %s435_s5 = sshll.u32 %s209_s27, 3 }
  0x3c   : > { %s218_s26 = scalar_lea.vmem %s831_s0, %s436_s30  ;;  %462 = vmatprep.subr.bf16.mxu0 %v654_v1  ;;  %s211_s9 = scalar_lea.vmem [#allocation5], %s435_s5 }
  0x3d   : > { %v223_v2 = vld [vmem:[%s218_s26] sm:$0xff]  ;;  %s329_s10 = sshll.u32 %s211_s9, 4  ;;  %s784_s19 = scalar_lea.hbm %s834_s3, %s440_s8  ;;  %s786_s10 = int_to_ptr.vmem [resolvable:$true] %s329_s10 }
  0x3e   : > { %227 = vperm.xlu0 %537, %v223_v2   ;;  %s315_s21 = scalar_lea.sflag [#allocation4], %s209_s27  ;;  %s566_s23 = scalar_lea.vmem %s786_s10, 128 }
  0x3f   : > { %464 = vmatpush3.bf16.msra.mxu0 %v463_v9  ;;  %p567_p8 = scmp.ne.s32.totalorder %s786_s10, %s566_s23  ;;  %p846_p10 = scmp.ne.s32.totalorder %s839_s22, 0 }
  0x40   : > { %s657_s15 = smov [#allocation5]  }
  0x41   : > { %p568_p11 = pnand %p567_p8, %p846_p10  ;;  %s570_s28 = sshll.u32 %s657_s15, 4  ;;  %s571_s28 = int_to_ptr.vmem [resolvable:$false] %s570_s28 }
  0x42   : > { %s572_s30 = scalar_lea.vmem %s571_s28, 256  ;;  %p573_p1 = scmp.lt.s32.totalorder %s786_s10, %s571_s28 }
  0x43   : > { %p569_p13 = pneg %p568_p11  ;;  %p574_p3 = scmp.lt.s32.totalorder %s572_s30, %s566_s23 }
  0x45   : > { %p575_p5 = por %p574_p3, %p573_p1 }
  0x47   : > { %p576_p6 = pnand %p575_p5, %p569_p13 }
  0xbd   : > { %v228_v12 = vpop.permute.xlu0 %227 }
  0xbe   : > { %vm229_vm2 = vcmp.eq.s32.totalorder %v228_v12, %v225_v11 }
  0xbf   : > { %v437_v13 = vsel %vm229_vm2, 1.0, %v656_v8 }
  0xc0   : > { %457 = vmatmul.mubr.msk.f32.vlgmr.msra.gmra.mrb[0].mxu0 %vm236_vm1, %v437_v13 }
 0x193   : > { %v306_v14 = vpop.f32.mrb[0].mxu0 }
 0x194   : > { %v310_v16 = vmul.f32 11.313708, %v306_v14  ;;  %v458_v17 = vpop.f32.mrb[1].mxu0 }
 0x196   : > { %v312_v18 = vadd.f32 %v311_v15, %v310_v16 }
 0x198   : > { %313 = vst [vmem:[%s211_s9] sm:$0xff] %v312_v18 }
 0x199   : > { %579 = shalt.err (!%p576_p6)
}
 0x19a   : > { %s580_s4 = scalar_lea.hbm %s784_s19, 128  ;;  %s584_s27 = scalar_lea.hbm %s834_s3, 256 }
 0x19b   : > { %p581_p7 = scmp.ne.s32.totalorder %s784_s19, %s580_s4  ;;  %p585_p0 = scmp.lt.u32.totalorder %s784_s19, %s834_s3 }
 0x19c   : > { %p586_p2 = scmp.lt.u32.totalorder %s584_s27, %s580_s4  ;;  %p588_p8 = scmp.lt.u32.totalorder %s580_s4, %s784_s19 }
 0x19d   : > { %p582_p9 = pnand %p581_p7, %p846_p10 }
 0x19e   : > { %p587_p4 = por %p586_p2, %p585_p0 }
 0x19f   : > { %p583_p12 = pneg %p582_p9 }
 0x1a0   : > { %p589_p11 = por %p588_p8, %p587_p4 }
 0x1a2   : > { %p590_p13 = pnand %p589_p11, %p583_p12 }
 0x1a4   : > { %593 = shalt.err (!%p590_p13)
}
 0x1a5   : > { %469 = dma.vmem_to_hbm [thread:$0]  (%p846_p10), %s786_s10, 128, %s784_s19, %s315_s21  }
 0x1a6 PF: > { %p481_p1 = scmp.ge.s32.totalorder %s648_s17, 2  ;;  %s341_s7 = sand.u32 1, %s628_s12  }
 0x1a7   : > { %p847_p3 = scmp.ne.s32.totalorder %s840_s24, 0  ;;  %s342_s8 = scalar_lea.sflag [#allocation4], %s341_s7 }
 0x1a9   : > { %p476_p5 = pnand %p481_p1, %p847_p3 }
 0x1ab   : > { %623 = dma.done.wait (!%p476_p5), %s342_s8, 128  }
 0x1ac   : > { %625 = vsyncadd (!%p476_p5), %s342_s8, 4294967168  ;;  %s17_s17 = sadd.s32 1, %s648_s17   ;;  %s848_s12 = smov %s632_s13 }
 0x1ad   : > { %p14_p6 = scmp.ge.s32.totalorder %s17_s17, 4   ;;  %s849_s13 = smov %s636_s14 }
 0x1ae   : > { %s850_s14 = smov %s731_s25  ;;  %s851_s15 = smov %s644_s16 }
 0x1af   : > { %s852_s16 = smov %s854_s20  ;;  %16 = sbr.rel (!%p14_p6) target bundleno = 5 (0x5), region = 75 }
 0x1b6   :  { %347 = vsyncpa [#allocation3], 1 }
 0x1b7   :  { %349 = vsyncpa [#allocation3 + $0x1], 1 }
 0x1b8   :  { %350 = vsyncpa [#allocation4], 1 }
 0x1b9   :  { %352 = vsyncpa [#allocation4 + $0x1], 1 }

</bundles_post_ra>
